<compile_context>
chip_gen: v6e
topology: v6e:2x2x1
jax: 0.10.0
libtpu: 0.0.40
codegen_flags: <defaults>
</compile_context>

<pallas_src>
import functools

import jax
import jax.numpy as jnp
import numpy as np
from jax.experimental import pallas as pl
from jax.experimental.pallas import tpu as pltpu


def _trans_down_kernel(x_ref, scale_ref, shift_ref, w_ref, b_ref, o_ref):
    """x_ref: (4, C, T) bf16 pool taps; scale/shift: (C, 1) f32 (0.25 folded in);
    w_ref: (Co, C) bf16; b_ref: (Co, 1) f32; o_ref: (Co, T) f32."""
    scale = scale_ref[...]
    shift = shift_ref[...]
    # Folded BN + ReLU per tap, summed == 2x2 average pool (factor already in scale/shift).
    pooled = jnp.maximum(x_ref[0].astype(jnp.float32) * scale + shift, 0.0)
    for t in range(1, 4):
        pooled = pooled + jnp.maximum(x_ref[t].astype(jnp.float32) * scale + shift, 0.0)
    # 1x1 conv == channel matmul on the pooled tensor (4x fewer pixels than pre-pool).
    y = jnp.dot(w_ref[...], pooled.astype(jnp.bfloat16),
                preferred_element_type=jnp.float32)                  # (Co, T)
    o_ref[...] = (y + b_ref[...]).astype(o_ref.dtype)


def _choose_tile(hhwh, per_col_bytes, cap_bytes):
    """Largest divisor T of hhwh with T % 128 == 0 and T * per_col_bytes <= cap_bytes.
    Falls back to the smallest 128-multiple divisor, then to the full axis
    (the full axis is always legal for the (8,128) BlockSpec rule)."""
    aligned = [t for t in range(128, hhwh + 1, 128) if hhwh % t == 0]
    within = [t for t in aligned if t * per_col_bytes <= cap_bytes]
    if within:
        return max(within)
    if aligned:
        return min(aligned)
    return hhwh


@functools.partial(jax.jit, static_argnames=("eps",))
def trans_down_forward(x_nchw, gamma, beta, conv_w, conv_b, eps=1e-5):
    """x_nchw: (N, C, H, W) float32. Returns (N, C//2, H//2, W//2) float32."""
    N, C, H, W = x_nchw.shape
    Co = conv_w.shape[0]
    assert H % 2 == 0 and W % 2 == 0, "2x2 AvgPool requires even H and W"
    Hh, Wh = H // 2, W // 2
    HhWh = Hh * Wh

    x_f32 = x_nchw.astype(jnp.float32)

    # BatchNorm training-mode batch stats (biased variance, centered two-pass form),
    # folded to per-channel scale/shift. The 0.25 avg-pool factor is folded in too.
    mu = jnp.mean(x_f32, axis=(0, 2, 3))                                        # (C,)
    var = jnp.mean(jnp.square(x_f32 - mu[None, :, None, None]), axis=(0, 2, 3))  # (C,)
    inv = gamma.astype(jnp.float32) / jnp.sqrt(var + eps)
    scale = (0.25 * inv).reshape(C, 1)
    shift = (0.25 * (beta.astype(jnp.float32) - mu * inv)).reshape(C, 1)

    # Tap-major bf16 packing: (N, C, H, W) -> (N, 4, C, Hh*Wh).  Single fused XLA
    # transpose whose output is half-width (bf16) -> ~2x less layout-plumbing HBM traffic.
    x_pk = jnp.transpose(
        x_f32.reshape(N, C, Hh, 2, Wh, 2), (0, 3, 5, 1, 2, 4)
    ).reshape(N, 4, C, HhWh).astype(jnp.bfloat16)

    w = conv_w.reshape(Co, C).astype(jnp.bfloat16)      # (Co, C), MXU-native bf16
    b = conv_b.reshape(Co, 1).astype(jnp.float32)

    # Generation-aware tile sizing (v7x: 64 MiB physical VMEM vs 128 MiB on v5e/v6e).
    try:
        vmem_cap = int(getattr(pltpu.get_tpu_info(), "vmem_capacity_bytes",
                               64 * 1024 * 1024))
    except Exception:
        vmem_cap = 64 * 1024 * 1024
    tile_cap = (6 if vmem_cap >= 100 * 1024 * 1024 else 4) * 1024 * 1024
    per_col_in = 4 * C * 2                               # bf16 input bytes per pooled pixel
    T = _choose_tile(HhWh, per_col_in, tile_cap)
    S = HhWh // T

    # Explicit scoped-VMEM budget: 2x double-buffered in/out tiles + f32 temporaries
    # (pooled accumulator etc.) + resident weight/scale blocks + margin.
    in_tile = per_col_in * T
    out_tile = Co * T * 4
    temps = 3 * C * T * 4
    params = 2 * (Co * C * 2 + Co * 4 + 2 * C * 4)
    need = 2 * in_tile + 2 * out_tile + temps + params + (2 << 20)
    hard_cap = (vmem_cap * 3) // 4                       # 96 MiB v5e/v6e, 48 MiB v7x
    vmem_limit = max(min(max(need, 48 * 1024 * 1024), hard_cap), need)

    out_flat = pl.pallas_call(
        _trans_down_kernel,
        out_shape=jax.ShapeDtypeStruct((N, Co, HhWh), jnp.float32),
        grid=(N, S),
        in_specs=[
            pl.BlockSpec((None, 4, C, T), lambda n, s: (n, 0, 0, s)),
            pl.BlockSpec((C, 1), lambda n, s: (0, 0)),
            pl.BlockSpec((C, 1), lambda n, s: (0, 0)),
            pl.BlockSpec((Co, C), lambda n, s: (0, 0)),
            pl.BlockSpec((Co, 1), lambda n, s: (0, 0)),
        ],
        out_specs=pl.BlockSpec((None, Co, T), lambda n, s: (n, 0, s)),
        compiler_params=pltpu.CompilerParams(
            dimension_semantics=("parallel", "parallel"),
            vmem_limit_bytes=int(vmem_limit)),
    )(x_pk, scale, shift, w, b)

    # (N, Co, Hh*Wh) -> NCHW is a free reshape (no transpose, no extra HBM pass).
    return out_flat.reshape(N, Co, Hh, Wh)


def _reference(x_nchw, gamma, beta, conv_w, conv_b, eps=1e-5):
    mu = jnp.mean(x_nchw, axis=(0, 2, 3), keepdims=True)
    var = jnp.mean((x_nchw - mu) ** 2, axis=(0, 2, 3), keepdims=True)
    xn = (x_nchw - mu) / jnp.sqrt(var + eps)
    xn = xn * gamma[None, :, None, None] + beta[None, :, None, None]
    xn = jnp.maximum(xn, 0.0)
    y = jnp.einsum('nchw,oc->nohw', xn, conv_w.reshape(conv_w.shape[0], -1)) \
        + conv_b[None, :, None, None]
    N, Co, H, W = y.shape
    return y.reshape(N, Co, H // 2, 2, W // 2, 2).mean(axis=(3, 5))


if __name__ == "__main__":
    N, C, H, W = 2, 16, 16, 16
    Co = C // 2

    key = jax.random.PRNGKey(0)
    kx, kw, kb = jax.random.split(key, 3)

    x = jax.random.normal(kx, (N, C, H, W), dtype=jnp.float32)

    # Deterministic synthetic parameters (BatchNorm affine + 1x1 conv).
    gamma = jnp.linspace(0.5, 1.5, C, dtype=jnp.float32)
    beta = jnp.linspace(-0.2, 0.2, C, dtype=jnp.float32)
    conv_w = jax.random.normal(kw, (Co, C, 1, 1), dtype=jnp.float32) * 0.1
    conv_b = jax.random.normal(kb, (Co,), dtype=jnp.float32) * 0.1

    out = jax.block_until_ready(trans_down_forward(x, gamma, beta, conv_w, conv_b))
    ref = jax.block_until_ready(_reference(x, gamma, beta, conv_w, conv_b))

    assert out.shape == (N, Co, H // 2, W // 2), out.shape
    # bf16 activation/weight path: ~3 decimal digits, so tolerance is loosened vs f32.
    np.testing.assert_allclose(np.asarray(out), np.asarray(ref), rtol=2e-2, atol=2e-2)
    print("KERNEL_OK")
</pallas_src>

<mosaic_0001>
module attributes {stable_mosaic.version = 11 : i64} {
  func.func @_trans_down_kernel(%arg0: i32, %arg1: i32, %arg2: memref<1x4x16x64xbf16, #tpu.memory_space<vmem>>, %arg3: memref<16x1xf32, #tpu.memory_space<vmem>>, %arg4: memref<16x1xf32, #tpu.memory_space<vmem>>, %arg5: memref<8x16xbf16, #tpu.memory_space<vmem>>, %arg6: memref<8x1xf32, #tpu.memory_space<vmem>>, %arg7: memref<1x8x64xf32, #tpu.memory_space<vmem>>) attributes {dimension_semantics = [#tpu.dimension_semantics<parallel>, #tpu.dimension_semantics<parallel>], iteration_bounds = array<i64: 2, 1>, scalar_prefetch = 0 : i64, scratch_operands = 0 : i64, tpu.core_type = #tpu.core_type<tc>, window_params = [{transform_indices = @transform_0, window_bounds = array<i64: 1, 4, 16, 64>}, {pipeline_mode = #tpu.pipeline_mode<synchronous>, transform_indices = @transform_1, window_bounds = array<i64: 16, 1>}, {pipeline_mode = #tpu.pipeline_mode<synchronous>, transform_indices = @transform_2, window_bounds = array<i64: 16, 1>}, {pipeline_mode = #tpu.pipeline_mode<synchronous>, transform_indices = @transform_3, window_bounds = array<i64: 8, 16>}, {pipeline_mode = #tpu.pipeline_mode<synchronous>, transform_indices = @transform_4, window_bounds = array<i64: 8, 1>}, {transform_indices = @transform_5, window_bounds = array<i64: 1, 8, 64>}]} {
    %c0 = arith.constant 0 : index
    %c0_0 = arith.constant 0 : index
    %0 = vector.load %arg3[%c0, %c0_0] : memref<16x1xf32, #tpu.memory_space<vmem>>, vector<16x1xf32>
    %c0_1 = arith.constant 0 : index
    %c0_2 = arith.constant 0 : index
    %1 = vector.load %arg4[%c0_1, %c0_2] : memref<16x1xf32, #tpu.memory_space<vmem>>, vector<16x1xf32>
    %c0_3 = arith.constant 0 : index
    %c0_4 = arith.constant 0 : index
    %c0_5 = arith.constant 0 : index
    %c0_6 = arith.constant 0 : index
    %2 = vector.load %arg2[%c0_3, %c0_4, %c0_5, %c0_6] : memref<1x4x16x64xbf16, #tpu.memory_space<vmem>>, vector<1x1x16x64xbf16>
    %3 = vector.shape_cast %2 : vector<1x1x16x64xbf16> to vector<16x64xbf16>
    %4 = arith.extf %3 : vector<16x64xbf16> to vector<16x64xf32>
    %5 = vector.broadcast %0 : vector<16x1xf32> to vector<16x64xf32>
    %6 = arith.mulf %4, %5 : vector<16x64xf32>
    %7 = vector.broadcast %1 : vector<16x1xf32> to vector<16x64xf32>
    %8 = arith.addf %6, %7 : vector<16x64xf32>
    %cst = arith.constant 0.000000e+00 : f32
    %9 = vector.broadcast %cst : f32 to vector<16x64xf32>
    %10 = arith.maximumf %8, %9 : vector<16x64xf32>
    %c0_7 = arith.constant 0 : index
    %c1 = arith.constant 1 : index
    %c0_8 = arith.constant 0 : index
    %c0_9 = arith.constant 0 : index
    %11 = vector.load %arg2[%c0_7, %c1, %c0_8, %c0_9] : memref<1x4x16x64xbf16, #tpu.memory_space<vmem>>, vector<1x1x16x64xbf16>
    %12 = vector.shape_cast %11 : vector<1x1x16x64xbf16> to vector<16x64xbf16>
    %13 = arith.extf %12 : vector<16x64xbf16> to vector<16x64xf32>
    %14 = vector.broadcast %0 : vector<16x1xf32> to vector<16x64xf32>
    %15 = arith.mulf %13, %14 : vector<16x64xf32>
    %16 = vector.broadcast %1 : vector<16x1xf32> to vector<16x64xf32>
    %17 = arith.addf %15, %16 : vector<16x64xf32>
    %cst_10 = arith.constant 0.000000e+00 : f32
    %18 = vector.broadcast %cst_10 : f32 to vector<16x64xf32>
    %19 = arith.maximumf %17, %18 : vector<16x64xf32>
    %20 = arith.addf %10, %19 : vector<16x64xf32>
    %c0_11 = arith.constant 0 : index
    %c2 = arith.constant 2 : index
    %c0_12 = arith.constant 0 : index
    %c0_13 = arith.constant 0 : index
    %21 = vector.load %arg2[%c0_11, %c2, %c0_12, %c0_13] : memref<1x4x16x64xbf16, #tpu.memory_space<vmem>>, vector<1x1x16x64xbf16>
    %22 = vector.shape_cast %21 : vector<1x1x16x64xbf16> to vector<16x64xbf16>
    %23 = arith.extf %22 : vector<16x64xbf16> to vector<16x64xf32>
    %24 = vector.broadcast %0 : vector<16x1xf32> to vector<16x64xf32>
    %25 = arith.mulf %23, %24 : vector<16x64xf32>
    %26 = vector.broadcast %1 : vector<16x1xf32> to vector<16x64xf32>
    %27 = arith.addf %25, %26 : vector<16x64xf32>
    %cst_14 = arith.constant 0.000000e+00 : f32
    %28 = vector.broadcast %cst_14 : f32 to vector<16x64xf32>
    %29 = arith.maximumf %27, %28 : vector<16x64xf32>
    %30 = arith.addf %20, %29 : vector<16x64xf32>
    %c0_15 = arith.constant 0 : index
    %c3 = arith.constant 3 : index
    %c0_16 = arith.constant 0 : index
    %c0_17 = arith.constant 0 : index
    %31 = vector.load %arg2[%c0_15, %c3, %c0_16, %c0_17] : memref<1x4x16x64xbf16, #tpu.memory_space<vmem>>, vector<1x1x16x64xbf16>
    %32 = vector.shape_cast %31 : vector<1x1x16x64xbf16> to vector<16x64xbf16>
    %33 = arith.extf %32 : vector<16x64xbf16> to vector<16x64xf32>
    %34 = vector.broadcast %0 : vector<16x1xf32> to vector<16x64xf32>
    %35 = arith.mulf %33, %34 : vector<16x64xf32>
    %36 = vector.broadcast %1 : vector<16x1xf32> to vector<16x64xf32>
    %37 = arith.addf %35, %36 : vector<16x64xf32>
    %cst_18 = arith.constant 0.000000e+00 : f32
    %38 = vector.broadcast %cst_18 : f32 to vector<16x64xf32>
    %39 = arith.maximumf %37, %38 : vector<16x64xf32>
    %40 = arith.addf %30, %39 : vector<16x64xf32>
    %c0_19 = arith.constant 0 : index
    %c0_20 = arith.constant 0 : index
    %41 = vector.load %arg5[%c0_19, %c0_20] : memref<8x16xbf16, #tpu.memory_space<vmem>>, vector<8x16xbf16>
    %42 = arith.truncf %40 : vector<16x64xf32> to vector<16x64xbf16>
    %cst_21 = arith.constant dense<0.000000e+00> : vector<8x64xf32>
    %43 = tpu.matmul %41, %42, %cst_21 {dimension_numbers = #tpu.dot_dimension_numbers<[1], [0], [0], [1], [0, 0, 1, 1], [], []>} : vector<8x16xbf16>, vector<16x64xbf16>, vector<8x64xf32> -> vector<8x64xf32>
    %c0_22 = arith.constant 0 : index
    %c0_23 = arith.constant 0 : index
    %44 = vector.load %arg6[%c0_22, %c0_23] : memref<8x1xf32, #tpu.memory_space<vmem>>, vector<8x1xf32>
    %45 = vector.broadcast %44 : vector<8x1xf32> to vector<8x64xf32>
    %46 = arith.addf %43, %45 : vector<8x64xf32>
    %c0_24 = arith.constant 0 : index
    %c0_25 = arith.constant 0 : index
    %c0_26 = arith.constant 0 : index
    %47 = vector.load %arg7[%c0_24, %c0_25, %c0_26] : memref<1x8x64xf32, #tpu.memory_space<vmem>>, vector<1x8x64xf32>
    %48 = vector.shape_cast %47 : vector<1x8x64xf32> to vector<8x64xf32>
    %49 = vector.shape_cast %46 : vector<8x64xf32> to vector<1x8x64xf32>
    tpu.vector_store %arg7[%c0_24, %c0_25, %c0_26], %49 {strides = array<i32>} : memref<1x8x64xf32, #tpu.memory_space<vmem>>, vector<1x8x64xf32>,
    return
  }
  func.func @transform_0(%arg0: i32, %arg1: i32) -> (i32, i32, i32, i32) {
    %c0_i32 = arith.constant 0 : i32
    %c0_i32_0 = arith.constant 0 : i32
    %c0_i32_1 = arith.constant 0 : i32
    return %arg0, %c0_i32, %c0_i32_0, %arg1 : i32, i32, i32, i32
  }
  func.func @transform_1(%arg0: i32, %arg1: i32) -> (i32, i32) {
    %c0_i32 = arith.constant 0 : i32
    %c0_i32_0 = arith.constant 0 : i32
    %c0_i32_1 = arith.constant 0 : i32
    return %c0_i32, %c0_i32_0 : i32, i32
  }
  func.func @transform_2(%arg0: i32, %arg1: i32) -> (i32, i32) {
    %c0_i32 = arith.constant 0 : i32
    %c0_i32_0 = arith.constant 0 : i32
    %c0_i32_1 = arith.constant 0 : i32
    return %c0_i32, %c0_i32_0 : i32, i32
  }
  func.func @transform_3(%arg0: i32, %arg1: i32) -> (i32, i32) {
    %c0_i32 = arith.constant 0 : i32
    %c0_i32_0 = arith.constant 0 : i32
    %c0_i32_1 = arith.constant 0 : i32
    return %c0_i32, %c0_i32_0 : i32, i32
  }
  func.func @transform_4(%arg0: i32, %arg1: i32) -> (i32, i32) {
    %c0_i32 = arith.constant 0 : i32
    %c0_i32_0 = arith.constant 0 : i32
    %c0_i32_1 = arith.constant 0 : i32
    return %c0_i32, %c0_i32_0 : i32, i32
  }
  func.func @transform_5(%arg0: i32, %arg1: i32) -> (i32, i32, i32) {
    %c0_i32 = arith.constant 0 : i32
    %c0_i32_0 = arith.constant 0 : i32
    return %arg0, %c0_i32, %arg1 : i32, i32, i32
  }
}

</mosaic_0001>

<bundles_post_ra>
// kernel: trans_down_forward.1
= control target key start
LH: loop header
LB: loop body
LE: loop exit
PB: predicated region body
PF: predicated region fallthrough
CT: control target
= control target key end

     0   :  { %s590_s18 = smov 0   ;;  %s592_s19 = smov 0   ;;  %s645_s0 = inlined_call_operand.vmem [shape: bf16[2,4,16,64], index: 0, kind: input, shape index: {}]   ;;  %s646_s1 = inlined_call_operand.vmem [shape: f32[16,1], index: 1, kind: input, shape index: {}]   ;;  %s647_s2 = inlined_call_operand.vmem [shape: f32[16,1], index: 2, kind: input, shape index: {}]   ;;  %s648_s3 = inlined_call_operand.vmem [shape: bf16[8,16], index: 3, kind: input, shape index: {}]   ;;  %s649_s4 = inlined_call_operand.vmem [shape: f32[8,1], index: 4, kind: input, shape index: {}]   ;;  %s650_s5 = inlined_call_operand.vmem [shape: f32[2,8,64], index: 5, kind: output, shape index: {}]  }
   0x1   :  { %s594_s20 = smov 0  }
   0x2 LB: > { %s27_s21 = sadd.s32 1, %s551_s19  ;;  %p463_p0 = scmp.ge.s32.totalorder %s555_s20, 1  ;;  %s555_s20 = sphi %s594_s20, %s15_s20   ;;  %s551_s19 = sphi %s592_s19, %s652_s19   ;;  %s547_s18 = sphi %s590_s18, %s651_s18  }
   0x3   : > { %p29_p1 = scmp.ge.s32.totalorder %s27_s21, 2  ;;  %p206_p2 = scmp.lt.s32.totalorder %s555_s20, 3 }
   0x5   : > { %s654_s21 = smov (%p29_p1, %s27_s21), 0  ;;  %p207_p3 = pnand %p463_p0, %p206_p2 }
   0x6   : > { %p239_p4 = scmp.lt.s32.totalorder (!%p207_p3), %s547_s18, 1 }
   0x7   : > { %210 = sbr.rel (%p207_p3) target bundleno = 358 (0x166), region = 40 }
   0xc   : > { %v257_v0 = vld [vmem:[%s647_s2] sm:$0xff]  ;;  %v557_v2 = vmov 0   ;;  %v258_v3 = vld [vmem:[%s647_s2 + $0x8] sm:$0xff]  ;;  %v558_v6 = vmov 0.0   ;;  %vm559_vm0 = vmmov 0   ;;  %s656_s18 = smov (!%p239_p4, %s547_s18), 1 }
   0xd   : > { %v255_v1 = vld [vmem:[%s646_s1] sm:$0xff]  ;;  %532 = vset.pattern.permute.xlu1 %v557_v2  ;;  %531 = vset.pattern.permute.xlu0 %v557_v2  ;;  %v256_v4 = vld [vmem:[%s646_s1 + $0x8] sm:$0xff]  ;;  %s476_s7 = sshll.u32 %s656_s18, 5  ;;  %vm336_vm1 = vcmask 130048   ;;  %s466_s13 = sshll.u32 %s656_s18, 3  ;;  %vm380_vm2 = vcmask 523264  }
   0xe   : > { %277 = vperm.xlu1 %532, %v257_v0   ;;  %265 = vperm.xlu0 %531, %v255_v1   ;;  %v330_v5 = vld [vmem:[%s649_s4] sm:$0xff]  ;;  %s246_s10 = scalar_lea.vmem %s645_s0, %s476_s7  ;;  %s253_s16 = scalar_lea.vmem %s650_s5, %s466_s13 }
   0xf   : > { %498 = vmatprep.subr.bf16.mxu0 %v558_v6  ;;  %500 = vmatprep.mubr.msk.bf16.mxu0 %vm559_vm0, %v558_v6  ;;  %v478_v7 = vld [vmem:[%s246_s10] sm:$0xff]   ;;  %v493_v8 = vld [vmem:[%s246_s10 + $0x8] sm:$0xff]   ;;  %v494_v9 = vld [vmem:[%s246_s10 + $0x10] sm:$0xff]  }
  0x10   : > { %v479_v10 = vunpack.c.l.bf16 %v478_v7  ;;  %v483_v11 = vunpack.c.l.bf16 %v493_v8  ;;  %v487_v12 = vunpack.c.l.bf16 %v494_v9  ;;  %v495_v13 = vld [vmem:[%s246_s10 + $0x18] sm:$0xff]   ;;  %v480_v17 = vunpack.c.h.bf16 %v478_v7  ;;  %v328_v54 = vld [vmem:[%s648_s3] sm:$0xf] }
  0x11   : > { %v491_v16 = vunpack.c.l.bf16 %v495_v13  ;;  %v484_v21 = vunpack.c.h.bf16 %v493_v8  ;;  %v488_v22 = vunpack.c.h.bf16 %v494_v9  ;;  %v492_v23 = vunpack.c.h.bf16 %v495_v13 }
  0x12   : > { %282 = vperm.xlu1 %532, %v258_v3   ;;  %270 = vperm.xlu0 %531, %v256_v4  }
  0x16   : > { %333 = vperm.xlu0 %531, %v330_v5  }
  0x89   : > { %v278_v14 = vpop.permute.xlu1 %277  ;;  %v266_v15 = vpop.permute.xlu0 %265 }
  0x8a   : > { %v273_v18 = vmul.f32 %v479_v10, %v266_v15  ;;  %v294_v19 = vmul.f32 %v483_v11, %v266_v15  ;;  %v307_v20 = vmul.f32 %v487_v12, %v266_v15  ;;  %v320_v27 = vmul.f32 %v491_v16, %v266_v15 }
  0x8c   : > { %v285_v24 = vadd.f32 %v278_v14, %v273_v18  ;;  %v296_v25 = vadd.f32 %v294_v19, %v278_v14  ;;  %v309_v26 = vadd.f32 %v307_v20, %v278_v14  ;;  %v322_v40 = vadd.f32 %v320_v27, %v278_v14 }
  0x8d   : > { %v271_v28 = vpop.permute.xlu0 %270  ;;  %v283_v33 = vpop.permute.xlu1 %282 }
  0x8e   : > { %v287_v29 = vmax.f32 %v285_v24, 0.0  ;;  %v298_v30 = vmax.f32 %v296_v25, 0.0  ;;  %v274_v31 = vmul.f32 %v480_v17, %v271_v28  ;;  %v295_v32 = vmul.f32 %v484_v21, %v271_v28 }
  0x8f   : > { %v308_v34 = vmul.f32 %v488_v22, %v271_v28  ;;  %v321_v35 = vmul.f32 %v492_v23, %v271_v28  ;;  %v311_v43 = vmax.f32 %v309_v26, 0.0  ;;  %v324_v49 = vmax.f32 %v322_v40, 0.0 }
  0x90   : > { %v286_v36 = vadd.f32 %v283_v33, %v274_v31  ;;  %v297_v37 = vadd.f32 %v295_v32, %v283_v33  ;;  %v300_v38 = vadd.f32 %v298_v30, %v287_v29 }
  0x91   : > { %v310_v39 = vadd.f32 %v308_v34, %v283_v33  ;;  %v323_v44 = vadd.f32 %v321_v35, %v283_v33  ;;  %v334_v55 = vpop.permute.xlu0 %333 }
  0x92   : > { %v288_v41 = vmax.f32 %v286_v36, 0.0  ;;  %v299_v42 = vmax.f32 %v297_v37, 0.0  ;;  %v313_v47 = vadd.f32 %v311_v43, %v300_v38 }
  0x93   : > { %v312_v46 = vmax.f32 %v310_v39, 0.0  ;;  %v325_v50 = vmax.f32 %v323_v44, 0.0 }
  0x94   : > { %v301_v45 = vadd.f32 %v299_v42, %v288_v41  ;;  %v326_v51 = vadd.f32 %v324_v49, %v313_v47 }
  0x96   : > { %v314_v48 = vadd.f32 %v312_v46, %v301_v45 }
  0x98   : > { %v327_v52 = vadd.f32 %v325_v50, %v314_v48 }
  0x9a   : > { %v329_v53 = vpack.c.bf16 %v327_v52, %v326_v51 }
  0x9c   : > { %499 = vmatpush3.bf16.msra.mxu0 %v329_v53 }
  0x9f   : > { %501 = vmatmul.mubr.msk.bf16.vlgmr.msra.gmra.mxu0 %vm336_vm1, %v328_v54 }
 0x15f   : > { %v374_v56 = vpop.f32.mrf.mxu0 }
 0x160   : > { %v375_v57 = vadd.f32 %v374_v56, %v334_v55 }
 0x161   : > { %v502_v58 = vpop.f32.mrf.mxu0 }
 0x162   : > { %381 = vst.msk [vmem:[%s253_s16] sm:$0xff] %vm380_vm2, %v375_v57 }
 0x163   : > { %v377_v59 = vpop.f32.mrf.mxu0 }
 0x165   : > { %v503_v60 = vpop.f32.mrf.mxu0 }
 0x166 PF: > { %s15_s20 = sadd.s32 1, %s555_s20   ;;  %s651_s18 = smov %s551_s19 }
 0x167   : > { %p12_p5 = scmp.ge.s32.totalorder %s15_s20, 4   ;;  %s652_s19 = smov %s654_s21 }
 0x169   :  { %14 = sbr.rel (!%p12_p5) target bundleno = 2 (0x2), region = 73 }

</bundles_post_ra>
